<compile_context>
chip_gen: v6e
topology: v6e:2x2x1
jax: 0.10.0
libtpu: 0.0.40
codegen_flags: <defaults>
</compile_context>

<pallas_src>
import jax
import jax.numpy as jnp
from jax.experimental import pallas as pl
from jax.experimental.pallas import tpu as pltpu


# ----------------------------- Pallas kernels --------------------------------

def _conv_pool_relu_kernel(p0_ref, p1_ref, p2_ref, p3_ref, w_ref, b_ref, o_ref):
    """Fused conv(as matmul) + 2x2 maxpool + bias + relu for one image.

    p*_ref : (1, K, S)   im2col patches for the 4 positions of each 2x2 pool
                         window (K = Cin*KH*KW, S = pooled_H * pooled_W).
    w_ref  : (Cout, K)   weight matrix (torch (Cout,Cin,KH,KW) flattened).
    b_ref  : (Cout, 1)   bias.
    o_ref  : (1, Cout, S) pooled + relu'd activations, NCHW, spatial flattened.
    """
    w = w_ref[...]
    y0 = jnp.dot(w, p0_ref[0], preferred_element_type=jnp.float32)
    y1 = jnp.dot(w, p1_ref[0], preferred_element_type=jnp.float32)
    y2 = jnp.dot(w, p2_ref[0], preferred_element_type=jnp.float32)
    y3 = jnp.dot(w, p3_ref[0], preferred_element_type=jnp.float32)
    y = jnp.maximum(jnp.maximum(y0, y1), jnp.maximum(y2, y3))   # maxpool 2x2
    y = jnp.maximum(y + b_ref[...], 0.0)                        # bias + relu
    o_ref[0] = y.astype(o_ref.dtype)


def _mlp_kernel(x_ref, w1_ref, b1_ref, w2_ref, b2_ref, o_ref):
    """Fused fc1 + relu + fc2; both weight tiles are VMEM-resident."""
    h = jnp.dot(x_ref[...], w1_ref[...], preferred_element_type=jnp.float32)
    h = jnp.maximum(h + b1_ref[...], 0.0)
    o = jnp.dot(h, w2_ref[...], preferred_element_type=jnp.float32) + b2_ref[...]
    o_ref[...] = o.astype(o_ref.dtype)


# ----------------------------- Pallas wrappers --------------------------------

def conv_pool_relu(phases, w_mat, b_col):
    """relu(maxpool2x2(conv(x) + b)) as a single pallas_call.

    phases: list of 4 arrays (N, K, S); w_mat: (Cout, K); b_col: (Cout, 1).
    Returns (N, Cout, S) float32 (NCHW with flattened spatial).
    """
    n, k, s = phases[0].shape
    cout = w_mat.shape[0]
    return pl.pallas_call(
        _conv_pool_relu_kernel,
        out_shape=jax.ShapeDtypeStruct((n, cout, s), jnp.float32),
        grid_spec=pltpu.PrefetchScalarGridSpec(
            num_scalar_prefetch=0,
            grid=(n,),                                   # one image per step
            in_specs=[pl.BlockSpec((1, k, s), lambda i: (i, 0, 0))] * 4
                     + [pl.BlockSpec((cout, k), lambda i: (0, 0)),
                        pl.BlockSpec((cout, 1), lambda i: (0, 0))],
            out_specs=pl.BlockSpec((1, cout, s), lambda i: (i, 0, 0)),
        ),
        compiler_params=pltpu.CompilerParams(
            dimension_semantics=("parallel",)),          # v7x: 2 TCs at N>=2
    )(*phases, w_mat, b_col)


def mlp(x, w1t, b1_row, w2t, b2_row):
    """relu(x @ w1t + b1) @ w2t + b2 as a single pallas_call."""
    n, k1 = x.shape
    h = w1t.shape[1]
    c = w2t.shape[1]
    return pl.pallas_call(
        _mlp_kernel,
        out_shape=jax.ShapeDtypeStruct((n, c), jnp.float32),
        grid_spec=pltpu.PrefetchScalarGridSpec(
            num_scalar_prefetch=0,
            grid=(1,),
            in_specs=[pl.BlockSpec((n, k1), lambda i: (0, 0)),
                      pl.BlockSpec((k1, h), lambda i: (0, 0)),
                      pl.BlockSpec((1, h), lambda i: (0, 0)),
                      pl.BlockSpec((h, c), lambda i: (0, 0)),
                      pl.BlockSpec((1, c), lambda i: (0, 0))],
            out_specs=pl.BlockSpec((n, c), lambda i: (0, 0)),
        ),
        compiler_params=pltpu.CompilerParams(
            dimension_semantics=("arbitrary",)),
    )(x, w1t, b1_row, w2t, b2_row)


# ------------------- pool-phase im2col (XLA glue, tiny) -----------------------

def _pool_phase_patches(x_nchw, kh, kw):
    """Build 4 patch matrices, one per position of each 2x2 pool window.

    x_nchw: (N, C, H, W). Returns list of 4 arrays (N, C*kh*kw, PH*PW) where
    PH = (H-kh+1)//2, PW = (W-kw+1)//2, K ordered (c, dy, dx) to match the
    torch (Cout, Cin, KH, KW) weight flatten.
    """
    n, c, h, w = x_nchw.shape
    ph, pw = (h - kh + 1) // 2, (w - kw + 1) // 2
    phases = []
    for a in range(2):
        for b in range(2):
            cols = []
            for dy in range(kh):
                for dx in range(kw):
                    cols.append(
                        x_nchw[:, :,
                               a + dy: a + dy + 2 * ph - 1: 2,
                               b + dx: b + dx + 2 * pw - 1: 2])  # (N,C,PH,PW)
            p = jnp.stack(cols, axis=2)              # (N, C, kh*kw, PH, PW)
            phases.append(p.reshape(n, c * kh * kw, ph * pw))
    return phases


# ----------------------------- Net forward ------------------------------------

def init_params(key):
    ks = jax.random.split(key, 8)
    s = 0.1
    return {
        "conv1_w": s * jax.random.normal(ks[0], (10, 1, 5, 5), jnp.float32),
        "conv1_b": s * jax.random.normal(ks[1], (10,), jnp.float32),
        "conv2_w": s * jax.random.normal(ks[2], (20, 10, 5, 5), jnp.float32),
        "conv2_b": s * jax.random.normal(ks[3], (20,), jnp.float32),
        "fc1_w": s * jax.random.normal(ks[4], (50, 320), jnp.float32),
        "fc1_b": s * jax.random.normal(ks[5], (50,), jnp.float32),
        "fc2_w": s * jax.random.normal(ks[6], (10, 50), jnp.float32),
        "fc2_b": s * jax.random.normal(ks[7], (10,), jnp.float32),
    }


def prepare_params(p):
    """One-time reshape/transpose of torch-layout params into kernel layouts."""
    return {
        "w1_mat": p["conv1_w"].reshape(10, 25),       # (Cout, Cin*KH*KW)
        "b1": p["conv1_b"].reshape(10, 1),
        "w2_mat": p["conv2_w"].reshape(20, 250),
        "b2": p["conv2_b"].reshape(20, 1),
        "fc1_wt": jnp.transpose(p["fc1_w"]),          # (320, 50)
        "fc1_b": p["fc1_b"].reshape(1, 50),
        "fc2_wt": jnp.transpose(p["fc2_w"]),          # (50, 10)
        "fc2_b": p["fc2_b"].reshape(1, 10),
    }


def net_forward(x_nchw, kp):
    n = x_nchw.shape[0]
    # conv1 block: conv(1->10,k5) + maxpool2 + relu, fused.
    phases1 = _pool_phase_patches(x_nchw, 5, 5)             # 4 x (N, 25, 144)
    h1 = conv_pool_relu(phases1, kp["w1_mat"], kp["b1"])    # (N, 10, 144)
    # conv2 block: conv(10->20,k5) + dropout2d(identity, eval) + pool + relu.
    # TODO(synk): Dropout2d is treated as identity (inference mode); no RNG mask.
    phases2 = _pool_phase_patches(h1.reshape(n, 10, 12, 12), 5, 5)  # 4x(N,250,16)
    h2 = conv_pool_relu(phases2, kp["w2_mat"], kp["b2"])    # (N, 20, 16)
    # (N, 20, 4*4) is already torch's (C,H,W) flatten order -> view(-1, 320).
    x = h2.reshape(n, 320)
    # fc1 + relu + fc2 fused in a single kernel.
    return mlp(x, kp["fc1_wt"], kp["fc1_b"], kp["fc2_wt"], kp["fc2_b"])


if __name__ == "__main__":
    key = jax.random.PRNGKey(0)
    k_x, k_p = jax.random.split(key)
    # 28x28 single-channel input is required by the 320-dim flatten.
    x = jax.random.normal(k_x, (2, 1, 28, 28), jnp.float32)
    params = init_params(k_p)
    kparams = prepare_params(params)

    out = jax.jit(net_forward)(x, kparams)
    out = jax.block_until_ready(out)
    assert out.shape == (2, 10) and out.dtype == jnp.float32
    print("KERNEL_OK")
</pallas_src>

<mosaic_0001>
module attributes {stable_mosaic.version = 11 : i64} {
  func.func @_conv_pool_relu_kernel(%arg0: i32, %arg1: memref<1x25x144xf32, #tpu.memory_space<vmem>>, %arg2: memref<1x25x144xf32, #tpu.memory_space<vmem>>, %arg3: memref<1x25x144xf32, #tpu.memory_space<vmem>>, %arg4: memref<1x25x144xf32, #tpu.memory_space<vmem>>, %arg5: memref<10x25xf32, #tpu.memory_space<vmem>>, %arg6: memref<10x1xf32, #tpu.memory_space<vmem>>, %arg7: memref<1x10x144xf32, #tpu.memory_space<vmem>>) attributes {dimension_semantics = [#tpu.dimension_semantics<parallel>], iteration_bounds = array<i64: 2>, scalar_prefetch = 0 : i64, scratch_operands = 0 : i64, tpu.core_type = #tpu.core_type<tc>, window_params = [{transform_indices = @transform_0, window_bounds = array<i64: 1, 25, 144>}, {transform_indices = @transform_1, window_bounds = array<i64: 1, 25, 144>}, {transform_indices = @transform_2, window_bounds = array<i64: 1, 25, 144>}, {transform_indices = @transform_3, window_bounds = array<i64: 1, 25, 144>}, {pipeline_mode = #tpu.pipeline_mode<synchronous>, transform_indices = @transform_4, window_bounds = array<i64: 10, 25>}, {pipeline_mode = #tpu.pipeline_mode<synchronous>, transform_indices = @transform_5, window_bounds = array<i64: 10, 1>}, {transform_indices = @transform_6, window_bounds = array<i64: 1, 10, 144>}]} {
    %c0 = arith.constant 0 : index
    %c0_0 = arith.constant 0 : index
    %0 = vector.load %arg5[%c0, %c0_0] : memref<10x25xf32, #tpu.memory_space<vmem>>, vector<10x25xf32>
    %c0_1 = arith.constant 0 : index
    %c0_2 = arith.constant 0 : index
    %c0_3 = arith.constant 0 : index
    %1 = vector.load %arg1[%c0_1, %c0_2, %c0_3] : memref<1x25x144xf32, #tpu.memory_space<vmem>>, vector<1x25x144xf32>
    %2 = vector.shape_cast %1 : vector<1x25x144xf32> to vector<25x144xf32>
    %cst = arith.constant dense<0.000000e+00> : vector<10x144xf32>
    %3 = tpu.matmul %0, %2, %cst {dimension_numbers = #tpu.dot_dimension_numbers<[1], [0], [0], [1], [0, 0, 1, 1], [], []>} : vector<10x25xf32>, vector<25x144xf32>, vector<10x144xf32> -> vector<10x144xf32>
    %c0_4 = arith.constant 0 : index
    %c0_5 = arith.constant 0 : index
    %c0_6 = arith.constant 0 : index
    %4 = vector.load %arg2[%c0_4, %c0_5, %c0_6] : memref<1x25x144xf32, #tpu.memory_space<vmem>>, vector<1x25x144xf32>
    %5 = vector.shape_cast %4 : vector<1x25x144xf32> to vector<25x144xf32>
    %cst_7 = arith.constant dense<0.000000e+00> : vector<10x144xf32>
    %6 = tpu.matmul %0, %5, %cst_7 {dimension_numbers = #tpu.dot_dimension_numbers<[1], [0], [0], [1], [0, 0, 1, 1], [], []>} : vector<10x25xf32>, vector<25x144xf32>, vector<10x144xf32> -> vector<10x144xf32>
    %c0_8 = arith.constant 0 : index
    %c0_9 = arith.constant 0 : index
    %c0_10 = arith.constant 0 : index
    %7 = vector.load %arg3[%c0_8, %c0_9, %c0_10] : memref<1x25x144xf32, #tpu.memory_space<vmem>>, vector<1x25x144xf32>
    %8 = vector.shape_cast %7 : vector<1x25x144xf32> to vector<25x144xf32>
    %cst_11 = arith.constant dense<0.000000e+00> : vector<10x144xf32>
    %9 = tpu.matmul %0, %8, %cst_11 {dimension_numbers = #tpu.dot_dimension_numbers<[1], [0], [0], [1], [0, 0, 1, 1], [], []>} : vector<10x25xf32>, vector<25x144xf32>, vector<10x144xf32> -> vector<10x144xf32>
    %c0_12 = arith.constant 0 : index
    %c0_13 = arith.constant 0 : index
    %c0_14 = arith.constant 0 : index
    %10 = vector.load %arg4[%c0_12, %c0_13, %c0_14] : memref<1x25x144xf32, #tpu.memory_space<vmem>>, vector<1x25x144xf32>
    %11 = vector.shape_cast %10 : vector<1x25x144xf32> to vector<25x144xf32>
    %cst_15 = arith.constant dense<0.000000e+00> : vector<10x144xf32>
    %12 = tpu.matmul %0, %11, %cst_15 {dimension_numbers = #tpu.dot_dimension_numbers<[1], [0], [0], [1], [0, 0, 1, 1], [], []>} : vector<10x25xf32>, vector<25x144xf32>, vector<10x144xf32> -> vector<10x144xf32>
    %13 = arith.maximumf %3, %6 : vector<10x144xf32>
    %14 = arith.maximumf %9, %12 : vector<10x144xf32>
    %15 = arith.maximumf %13, %14 : vector<10x144xf32>
    %c0_16 = arith.constant 0 : index
    %c0_17 = arith.constant 0 : index
    %16 = vector.load %arg6[%c0_16, %c0_17] : memref<10x1xf32, #tpu.memory_space<vmem>>, vector<10x1xf32>
    %17 = vector.broadcast %16 : vector<10x1xf32> to vector<10x144xf32>
    %18 = arith.addf %15, %17 : vector<10x144xf32>
    %cst_18 = arith.constant 0.000000e+00 : f32
    %19 = vector.broadcast %cst_18 : f32 to vector<10x144xf32>
    %20 = arith.maximumf %18, %19 : vector<10x144xf32>
    %c0_19 = arith.constant 0 : index
    %c0_20 = arith.constant 0 : index
    %c0_21 = arith.constant 0 : index
    %21 = vector.load %arg7[%c0_19, %c0_20, %c0_21] : memref<1x10x144xf32, #tpu.memory_space<vmem>>, vector<1x10x144xf32>
    %22 = vector.shape_cast %21 : vector<1x10x144xf32> to vector<10x144xf32>
    %23 = vector.shape_cast %20 : vector<10x144xf32> to vector<1x10x144xf32>
    tpu.vector_store %arg7[%c0_19, %c0_20, %c0_21], %23 {strides = array<i32>} : memref<1x10x144xf32, #tpu.memory_space<vmem>>, vector<1x10x144xf32>,
    return
  }
  func.func @transform_0(%arg0: i32) -> (i32, i32, i32) {
    %c0_i32 = arith.constant 0 : i32
    %c0_i32_0 = arith.constant 0 : i32
    %c0_i32_1 = arith.constant 0 : i32
    return %arg0, %c0_i32, %c0_i32_0 : i32, i32, i32
  }
  func.func @transform_1(%arg0: i32) -> (i32, i32, i32) {
    %c0_i32 = arith.constant 0 : i32
    %c0_i32_0 = arith.constant 0 : i32
    %c0_i32_1 = arith.constant 0 : i32
    return %arg0, %c0_i32, %c0_i32_0 : i32, i32, i32
  }
  func.func @transform_2(%arg0: i32) -> (i32, i32, i32) {
    %c0_i32 = arith.constant 0 : i32
    %c0_i32_0 = arith.constant 0 : i32
    %c0_i32_1 = arith.constant 0 : i32
    return %arg0, %c0_i32, %c0_i32_0 : i32, i32, i32
  }
  func.func @transform_3(%arg0: i32) -> (i32, i32, i32) {
    %c0_i32 = arith.constant 0 : i32
    %c0_i32_0 = arith.constant 0 : i32
    %c0_i32_1 = arith.constant 0 : i32
    return %arg0, %c0_i32, %c0_i32_0 : i32, i32, i32
  }
  func.func @transform_4(%arg0: i32) -> (i32, i32) {
    %c0_i32 = arith.constant 0 : i32
    %c0_i32_0 = arith.constant 0 : i32
    %c0_i32_1 = arith.constant 0 : i32
    return %c0_i32, %c0_i32_0 : i32, i32
  }
  func.func @transform_5(%arg0: i32) -> (i32, i32) {
    %c0_i32 = arith.constant 0 : i32
    %c0_i32_0 = arith.constant 0 : i32
    %c0_i32_1 = arith.constant 0 : i32
    return %c0_i32, %c0_i32_0 : i32, i32
  }
  func.func @transform_6(%arg0: i32) -> (i32, i32, i32) {
    %c0_i32 = arith.constant 0 : i32
    %c0_i32_0 = arith.constant 0 : i32
    %c0_i32_1 = arith.constant 0 : i32
    return %arg0, %c0_i32, %c0_i32_0 : i32, i32, i32
  }
}

module attributes {stable_mosaic.version = 11 : i64} {
  func.func @_conv_pool_relu_kernel(%arg0: i32, %arg1: memref<1x250x16xf32, #tpu.memory_space<vmem>>, %arg2: memref<1x250x16xf32, #tpu.memory_space<vmem>>, %arg3: memref<1x250x16xf32, #tpu.memory_space<vmem>>, %arg4: memref<1x250x16xf32, #tpu.memory_space<vmem>>, %arg5: memref<20x250xf32, #tpu.memory_space<vmem>>, %arg6: memref<20x1xf32, #tpu.memory_space<vmem>>, %arg7: memref<1x20x16xf32, #tpu.memory_space<vmem>>) attributes {dimension_semantics = [#tpu.dimension_semantics<parallel>], iteration_bounds = array<i64: 2>, scalar_prefetch = 0 : i64, scratch_operands = 0 : i64, tpu.core_type = #tpu.core_type<tc>, window_params = [{transform_indices = @transform_0, window_bounds = array<i64: 1, 250, 16>}, {transform_indices = @transform_1, window_bounds = array<i64: 1, 250, 16>}, {transform_indices = @transform_2, window_bounds = array<i64: 1, 250, 16>}, {transform_indices = @transform_3, window_bounds = array<i64: 1, 250, 16>}, {pipeline_mode = #tpu.pipeline_mode<synchronous>, transform_indices = @transform_4, window_bounds = array<i64: 20, 250>}, {pipeline_mode = #tpu.pipeline_mode<synchronous>, transform_indices = @transform_5, window_bounds = array<i64: 20, 1>}, {transform_indices = @transform_6, window_bounds = array<i64: 1, 20, 16>}]} {
    %c0 = arith.constant 0 : index
    %c0_0 = arith.constant 0 : index
    %0 = vector.load %arg5[%c0, %c0_0] : memref<20x250xf32, #tpu.memory_space<vmem>>, vector<20x250xf32>
    %c0_1 = arith.constant 0 : index
    %c0_2 = arith.constant 0 : index
    %c0_3 = arith.constant 0 : index
    %1 = vector.load %arg1[%c0_1, %c0_2, %c0_3] : memref<1x250x16xf32, #tpu.memory_space<vmem>>, vector<1x250x16xf32>
    %2 = vector.shape_cast %1 : vector<1x250x16xf32> to vector<250x16xf32>
    %cst = arith.constant dense<0.000000e+00> : vector<20x16xf32>
    %3 = tpu.matmul %0, %2, %cst {dimension_numbers = #tpu.dot_dimension_numbers<[1], [0], [0], [1], [0, 0, 1, 1], [], []>} : vector<20x250xf32>, vector<250x16xf32>, vector<20x16xf32> -> vector<20x16xf32>
    %c0_4 = arith.constant 0 : index
    %c0_5 = arith.constant 0 : index
    %c0_6 = arith.constant 0 : index
    %4 = vector.load %arg2[%c0_4, %c0_5, %c0_6] : memref<1x250x16xf32, #tpu.memory_space<vmem>>, vector<1x250x16xf32>
    %5 = vector.shape_cast %4 : vector<1x250x16xf32> to vector<250x16xf32>
    %cst_7 = arith.constant dense<0.000000e+00> : vector<20x16xf32>
    %6 = tpu.matmul %0, %5, %cst_7 {dimension_numbers = #tpu.dot_dimension_numbers<[1], [0], [0], [1], [0, 0, 1, 1], [], []>} : vector<20x250xf32>, vector<250x16xf32>, vector<20x16xf32> -> vector<20x16xf32>
    %c0_8 = arith.constant 0 : index
    %c0_9 = arith.constant 0 : index
    %c0_10 = arith.constant 0 : index
    %7 = vector.load %arg3[%c0_8, %c0_9, %c0_10] : memref<1x250x16xf32, #tpu.memory_space<vmem>>, vector<1x250x16xf32>
    %8 = vector.shape_cast %7 : vector<1x250x16xf32> to vector<250x16xf32>
    %cst_11 = arith.constant dense<0.000000e+00> : vector<20x16xf32>
    %9 = tpu.matmul %0, %8, %cst_11 {dimension_numbers = #tpu.dot_dimension_numbers<[1], [0], [0], [1], [0, 0, 1, 1], [], []>} : vector<20x250xf32>, vector<250x16xf32>, vector<20x16xf32> -> vector<20x16xf32>
    %c0_12 = arith.constant 0 : index
    %c0_13 = arith.constant 0 : index
    %c0_14 = arith.constant 0 : index
    %10 = vector.load %arg4[%c0_12, %c0_13, %c0_14] : memref<1x250x16xf32, #tpu.memory_space<vmem>>, vector<1x250x16xf32>
    %11 = vector.shape_cast %10 : vector<1x250x16xf32> to vector<250x16xf32>
    %cst_15 = arith.constant dense<0.000000e+00> : vector<20x16xf32>
    %12 = tpu.matmul %0, %11, %cst_15 {dimension_numbers = #tpu.dot_dimension_numbers<[1], [0], [0], [1], [0, 0, 1, 1], [], []>} : vector<20x250xf32>, vector<250x16xf32>, vector<20x16xf32> -> vector<20x16xf32>
    %13 = arith.maximumf %3, %6 : vector<20x16xf32>
    %14 = arith.maximumf %9, %12 : vector<20x16xf32>
    %15 = arith.maximumf %13, %14 : vector<20x16xf32>
    %c0_16 = arith.constant 0 : index
    %c0_17 = arith.constant 0 : index
    %16 = vector.load %arg6[%c0_16, %c0_17] : memref<20x1xf32, #tpu.memory_space<vmem>>, vector<20x1xf32>
    %17 = vector.broadcast %16 : vector<20x1xf32> to vector<20x16xf32>
    %18 = arith.addf %15, %17 : vector<20x16xf32>
    %cst_18 = arith.constant 0.000000e+00 : f32
    %19 = vector.broadcast %cst_18 : f32 to vector<20x16xf32>
    %20 = arith.maximumf %18, %19 : vector<20x16xf32>
    %c0_19 = arith.constant 0 : index
    %c0_20 = arith.constant 0 : index
    %c0_21 = arith.constant 0 : index
    %21 = vector.load %arg7[%c0_19, %c0_20, %c0_21] : memref<1x20x16xf32, #tpu.memory_space<vmem>>, vector<1x20x16xf32>
    %22 = vector.shape_cast %21 : vector<1x20x16xf32> to vector<20x16xf32>
    %23 = vector.shape_cast %20 : vector<20x16xf32> to vector<1x20x16xf32>
    tpu.vector_store %arg7[%c0_19, %c0_20, %c0_21], %23 {strides = array<i32>} : memref<1x20x16xf32, #tpu.memory_space<vmem>>, vector<1x20x16xf32>,
    return
  }
  func.func @transform_0(%arg0: i32) -> (i32, i32, i32) {
    %c0_i32 = arith.constant 0 : i32
    %c0_i32_0 = arith.constant 0 : i32
    %c0_i32_1 = arith.constant 0 : i32
    return %arg0, %c0_i32, %c0_i32_0 : i32, i32, i32
  }
  func.func @transform_1(%arg0: i32) -> (i32, i32, i32) {
    %c0_i32 = arith.constant 0 : i32
    %c0_i32_0 = arith.constant 0 : i32
    %c0_i32_1 = arith.constant 0 : i32
    return %arg0, %c0_i32, %c0_i32_0 : i32, i32, i32
  }
  func.func @transform_2(%arg0: i32) -> (i32, i32, i32) {
    %c0_i32 = arith.constant 0 : i32
    %c0_i32_0 = arith.constant 0 : i32
    %c0_i32_1 = arith.constant 0 : i32
    return %arg0, %c0_i32, %c0_i32_0 : i32, i32, i32
  }
  func.func @transform_3(%arg0: i32) -> (i32, i32, i32) {
    %c0_i32 = arith.constant 0 : i32
    %c0_i32_0 = arith.constant 0 : i32
    %c0_i32_1 = arith.constant 0 : i32
    return %arg0, %c0_i32, %c0_i32_0 : i32, i32, i32
  }
  func.func @transform_4(%arg0: i32) -> (i32, i32) {
    %c0_i32 = arith.constant 0 : i32
    %c0_i32_0 = arith.constant 0 : i32
    %c0_i32_1 = arith.constant 0 : i32
    return %c0_i32, %c0_i32_0 : i32, i32
  }
  func.func @transform_5(%arg0: i32) -> (i32, i32) {
    %c0_i32 = arith.constant 0 : i32
    %c0_i32_0 = arith.constant 0 : i32
    %c0_i32_1 = arith.constant 0 : i32
    return %c0_i32, %c0_i32_0 : i32, i32
  }
  func.func @transform_6(%arg0: i32) -> (i32, i32, i32) {
    %c0_i32 = arith.constant 0 : i32
    %c0_i32_0 = arith.constant 0 : i32
    %c0_i32_1 = arith.constant 0 : i32
    return %arg0, %c0_i32, %c0_i32_0 : i32, i32, i32
  }
}

module attributes {stable_mosaic.version = 11 : i64} {
  func.func @_mlp_kernel(%arg0: i32, %arg1: memref<2x320xf32, #tpu.memory_space<vmem>>, %arg2: memref<320x50xf32, #tpu.memory_space<vmem>>, %arg3: memref<1x50xf32, #tpu.memory_space<vmem>>, %arg4: memref<50x10xf32, #tpu.memory_space<vmem>>, %arg5: memref<1x10xf32, #tpu.memory_space<vmem>>, %arg6: memref<2x10xf32, #tpu.memory_space<vmem>>) attributes {dimension_semantics = [#tpu.dimension_semantics<arbitrary>], iteration_bounds = array<i64: 1>, scalar_prefetch = 0 : i64, scratch_operands = 0 : i64, tpu.core_type = #tpu.core_type<tc>, window_params = [{pipeline_mode = #tpu.pipeline_mode<synchronous>, transform_indices = @transform_0, window_bounds = array<i64: 2, 320>}, {pipeline_mode = #tpu.pipeline_mode<synchronous>, transform_indices = @transform_1, window_bounds = array<i64: 320, 50>}, {pipeline_mode = #tpu.pipeline_mode<synchronous>, transform_indices = @transform_2, window_bounds = array<i64: 1, 50>}, {pipeline_mode = #tpu.pipeline_mode<synchronous>, transform_indices = @transform_3, window_bounds = array<i64: 50, 10>}, {pipeline_mode = #tpu.pipeline_mode<synchronous>, transform_indices = @transform_4, window_bounds = array<i64: 1, 10>}, {pipeline_mode = #tpu.pipeline_mode<synchronous>, transform_indices = @transform_5, window_bounds = array<i64: 2, 10>}]} {
    %c0 = arith.constant 0 : index
    %c0_0 = arith.constant 0 : index
    %0 = vector.load %arg1[%c0, %c0_0] : memref<2x320xf32, #tpu.memory_space<vmem>>, vector<2x320xf32>
    %c0_1 = arith.constant 0 : index
    %c0_2 = arith.constant 0 : index
    %1 = vector.load %arg2[%c0_1, %c0_2] : memref<320x50xf32, #tpu.memory_space<vmem>>, vector<320x50xf32>
    %cst = arith.constant dense<0.000000e+00> : vector<2x50xf32>
    %2 = tpu.matmul %0, %1, %cst {dimension_numbers = #tpu.dot_dimension_numbers<[1], [0], [0], [1], [0, 0, 1, 1], [], []>} : vector<2x320xf32>, vector<320x50xf32>, vector<2x50xf32> -> vector<2x50xf32>
    %c0_3 = arith.constant 0 : index
    %c0_4 = arith.constant 0 : index
    %3 = vector.load %arg3[%c0_3, %c0_4] : memref<1x50xf32, #tpu.memory_space<vmem>>, vector<1x50xf32>
    %4 = vector.broadcast %3 : vector<1x50xf32> to vector<2x50xf32>
    %5 = arith.addf %2, %4 : vector<2x50xf32>
    %cst_5 = arith.constant 0.000000e+00 : f32
    %6 = vector.broadcast %cst_5 : f32 to vector<2x50xf32>
    %7 = arith.maximumf %5, %6 : vector<2x50xf32>
    %c0_6 = arith.constant 0 : index
    %c0_7 = arith.constant 0 : index
    %8 = vector.load %arg4[%c0_6, %c0_7] : memref<50x10xf32, #tpu.memory_space<vmem>>, vector<50x10xf32>
    %cst_8 = arith.constant dense<0.000000e+00> : vector<2x10xf32>
    %9 = tpu.matmul %7, %8, %cst_8 {dimension_numbers = #tpu.dot_dimension_numbers<[1], [0], [0], [1], [0, 0, 1, 1], [], []>} : vector<2x50xf32>, vector<50x10xf32>, vector<2x10xf32> -> vector<2x10xf32>
    %c0_9 = arith.constant 0 : index
    %c0_10 = arith.constant 0 : index
    %10 = vector.load %arg5[%c0_9, %c0_10] : memref<1x10xf32, #tpu.memory_space<vmem>>, vector<1x10xf32>
    %11 = vector.broadcast %10 : vector<1x10xf32> to vector<2x10xf32>
    %12 = arith.addf %9, %11 : vector<2x10xf32>
    %c0_11 = arith.constant 0 : index
    %c0_12 = arith.constant 0 : index
    %13 = vector.load %arg6[%c0_11, %c0_12] : memref<2x10xf32, #tpu.memory_space<vmem>>, vector<2x10xf32>
    tpu.vector_store %arg6[%c0_11, %c0_12], %12 {strides = array<i32>} : memref<2x10xf32, #tpu.memory_space<vmem>>, vector<2x10xf32>,
    return
  }
  func.func @transform_0(%arg0: i32) -> (i32, i32) {
    %c0_i32 = arith.constant 0 : i32
    %c0_i32_0 = arith.constant 0 : i32
    %c0_i32_1 = arith.constant 0 : i32
    return %c0_i32, %c0_i32_0 : i32, i32
  }
  func.func @transform_1(%arg0: i32) -> (i32, i32) {
    %c0_i32 = arith.constant 0 : i32
    %c0_i32_0 = arith.constant 0 : i32
    %c0_i32_1 = arith.constant 0 : i32
    return %c0_i32, %c0_i32_0 : i32, i32
  }
  func.func @transform_2(%arg0: i32) -> (i32, i32) {
    %c0_i32 = arith.constant 0 : i32
    %c0_i32_0 = arith.constant 0 : i32
    %c0_i32_1 = arith.constant 0 : i32
    return %c0_i32, %c0_i32_0 : i32, i32
  }
  func.func @transform_3(%arg0: i32) -> (i32, i32) {
    %c0_i32 = arith.constant 0 : i32
    %c0_i32_0 = arith.constant 0 : i32
    %c0_i32_1 = arith.constant 0 : i32
    return %c0_i32, %c0_i32_0 : i32, i32
  }
  func.func @transform_4(%arg0: i32) -> (i32, i32) {
    %c0_i32 = arith.constant 0 : i32
    %c0_i32_0 = arith.constant 0 : i32
    %c0_i32_1 = arith.constant 0 : i32
    return %c0_i32, %c0_i32_0 : i32, i32
  }
  func.func @transform_5(%arg0: i32) -> (i32, i32) {
    %c0_i32 = arith.constant 0 : i32
    %c0_i32_0 = arith.constant 0 : i32
    %c0_i32_1 = arith.constant 0 : i32
    return %c0_i32, %c0_i32_0 : i32, i32
  }
}

</mosaic_0001>

<bundles_post_ra>
// kernel: net_forward.3
= control target key start
LH: loop header
LB: loop body
LE: loop exit
PB: predicated region body
PF: predicated region fallthrough
CT: control target
= control target key end

     0   :  { %s909_s21 = smov 0   ;;  %s995_s0 = inlined_call_operand.vmem [shape: f32[2,25,144], index: 0, kind: input, shape index: {}]   ;;  %s996_s1 = inlined_call_operand.vmem [shape: f32[2,25,144], index: 1, kind: input, shape index: {}]   ;;  %s997_s2 = inlined_call_operand.vmem [shape: f32[2,25,144], index: 2, kind: input, shape index: {}]   ;;  %s998_s3 = inlined_call_operand.vmem [shape: f32[2,25,144], index: 3, kind: input, shape index: {}]   ;;  %s999_s4 = inlined_call_operand.vmem [shape: f32[10,25], index: 4, kind: input, shape index: {}]   ;;  %s1000_s5 = inlined_call_operand.vmem [shape: f32[10,1], index: 5, kind: input, shape index: {}]   ;;  %s1001_s6 = inlined_call_operand.vmem [shape: f32[2,10,144], index: 6, kind: output, shape index: {}]  }
   0x1 LB: > { %s815_s22 = sadd.s32 4294967295, %s870_s21   ;;  %p819_p0 = scmp.ge.s32.totalorder %s870_s21, 1  ;;  %s870_s21 = sphi %s909_s21, %s16_s21  }
   0x2   : > { %p242_p1 = scmp.lt.s32.totalorder %s870_s21, 3 }
   0x4   : > { %p243_p2 = pnand %p819_p0, %p242_p1 }
   0x5   : > { %p287_p3 = scmp.lt.s32.totalorder (!%p243_p2), %s815_s22, 1 }
   0x6   : > { %246 = sbr.rel (%p243_p2) target bundleno = 244 (0xf4), region = 44 }
   0xb   : > { %v872_v0 = vmov 0.0   ;;  %v698_v1 = vld [vmem:[%s1000_s5] sm:$0xff]  ;;  %s1003_s22 = smov (!%p287_p3, %s815_s22), 1  ;;  %v873_v2 = vmov 0   ;;  %vm329_vm0 = vcmask 1040384   ;;  %vm322_vm1 = vcmask 203776  }
   0xc   : > { %400 = vmatprep.mubr.f32.mxu0 %v872_v0  ;;  %491 = vmatprep.mubr.f32.mxu1 %v872_v0  ;;  %s848_s25 = sshll.u32 %s1003_s22, 6  ;;  %v312_v19 = vld [vmem:[%s999_s4] sm:$0xff]  ;;  %v313_v28 = vld [vmem:[%s999_s4 + $0x8] sm:$0x3]  ;;  %s852_s20 = sshll.u32 %s1003_s22, 5  ;;  %vm719_vm2 = vcmask 130048  }
   0xd   : > { %863 = vset.pattern.permute.xlu0 %v873_v2  ;;  %s291_s28 = scalar_lea.vmem %s995_s0, %s848_s25  ;;  %s296_s7 = scalar_lea.vmem %s996_s1, %s848_s25  ;;  %v699_v37 = vld [vmem:[%s1000_s5 + $0x8] sm:$0x3]  ;;  %vm722_vm3 = vcmask 123904  }
   0xe   : > { %702 = vperm.xlu0 %863, %v698_v1   ;;  %v321_v3 = vld [vmem:[%s291_s28 + $0x38] sm:$0x1]  ;;  %v320_v5 = vld [vmem:[%s291_s28 + $0x30] sm:$0x1]  ;;  %v319_v7 = vld [vmem:[%s291_s28 + $0x28] sm:$0xff]  ;;  %s938_s10 = scalar_lea.vmem %s997_s2, %s848_s25  ;;  %s943_s13 = scalar_lea.vmem %s998_s3, %s848_s25 }
   0xf   : > { %v420_v4 = vld [vmem:[%s296_s7 + $0x38] sm:$0x1]  ;;  %830 = vmatprep.subr.msk.mxu0 %vm329_vm0, %v321_v3  ;;  %v419_v6 = vld [vmem:[%s296_s7 + $0x30] sm:$0x1]  ;;  %v418_v8 = vld [vmem:[%s296_s7 + $0x28] sm:$0xff]  ;;  %s311_s25 = scalar_lea.vmem %s1001_s6, %s852_s20 }
  0x10   : > { %834 = vmatprep.subr.msk.mxu1 %vm329_vm0, %v420_v4  ;;  %831 = vmatpush1.msk.msra.mxu0 %vm329_vm0, %v320_v5  ;;  %v318_v9 = vld [vmem:[%s291_s28 + $0x20] sm:$0xff]  ;;  %v317_v11 = vld [vmem:[%s291_s28 + $0x18] sm:$0xff]  ;;  %v316_v13 = vld [vmem:[%s291_s28 + $0x10] sm:$0xff] }
  0x11   : > { %835 = vmatpush1.msk.msra.mxu1 %vm329_vm0, %v419_v6  ;;  %v417_v10 = vld [vmem:[%s296_s7 + $0x20] sm:$0xff]  ;;  %362 = vmatprep.subr.mxu0 %v319_v7  ;;  %v416_v12 = vld [vmem:[%s296_s7 + $0x18] sm:$0xff]  ;;  %v415_v14 = vld [vmem:[%s296_s7 + $0x10] sm:$0xff] }
  0x12   : > { %453 = vmatprep.subr.mxu1 %v418_v8  ;;  %363 = vmatpush1.msra.mxu0 %v318_v9  ;;  %v315_v15 = vld [vmem:[%s291_s28 + $0x8] sm:$0xff]  ;;  %v314_v17 = vld [vmem:[%s291_s28] sm:$0xff]  ;;  %v511_v20 = vld [vmem:[%s938_s10 + $0x38] sm:$0x1] }
  0x13   : > { %454 = vmatpush1.msra.mxu1 %v417_v10  ;;  %v414_v16 = vld [vmem:[%s296_s7 + $0x8] sm:$0xff]  ;;  %364 = vmatprep.subr.mxu0 %v317_v11  ;;  %v413_v18 = vld [vmem:[%s296_s7] sm:$0xff]  ;;  %v602_v21 = vld [vmem:[%s943_s13 + $0x38] sm:$0x1] }
  0x14   : > { %455 = vmatprep.subr.mxu1 %v416_v12  ;;  %365 = vmatpush1.msra.mxu0 %v316_v13  ;;  %v510_v22 = vld [vmem:[%s938_s10 + $0x30] sm:$0x1]  ;;  %v509_v24 = vld [vmem:[%s938_s10 + $0x28] sm:$0xff]  ;;  %v508_v26 = vld [vmem:[%s938_s10 + $0x20] sm:$0xff] }
  0x15   : > { %456 = vmatpush1.msra.mxu1 %v415_v14  ;;  %366 = vmatprep.subr.mxu0 %v315_v15  ;;  %v601_v23 = vld [vmem:[%s943_s13 + $0x30] sm:$0x1]  ;;  %v600_v25 = vld [vmem:[%s943_s13 + $0x28] sm:$0xff]  ;;  %v599_v27 = vld [vmem:[%s943_s13 + $0x20] sm:$0xff] }
  0x16   : > { %457 = vmatprep.subr.mxu1 %v414_v16  ;;  %367 = vmatpush1.msra.mxu0 %v314_v17  ;;  %v507_v29 = vld [vmem:[%s938_s10 + $0x18] sm:$0xff]  ;;  %v506_v31 = vld [vmem:[%s938_s10 + $0x10] sm:$0xff]  ;;  %v505_v33 = vld [vmem:[%s938_s10 + $0x8] sm:$0xff] }
  0x17   : > { %458 = vmatpush1.msra.mxu1 %v413_v18  ;;  %832 = vmatmul.mubr.msk.f32.vlgmr.msra.gmra.mxu0 %vm322_vm1, %v312_v19  ;;  %v598_v30 = vld [vmem:[%s943_s13 + $0x18] sm:$0xff]  ;;  %v597_v32 = vld [vmem:[%s943_s13 + $0x10] sm:$0xff]  ;;  %v596_v34 = vld [vmem:[%s943_s13 + $0x8] sm:$0xff] }
  0x18   : > { %836 = vmatmul.mubr.msk.f32.vlgmr.msra.gmra.mxu1 %vm322_vm1, %v312_v19  ;;  %838 = vmatprep.subr.msk.mxu0 %vm329_vm0, %v511_v20  ;;  %v504_v35 = vld [vmem:[%s938_s10] sm:$0xff] }
  0x19   : > { %842 = vmatprep.subr.msk.mxu1 %vm329_vm0, %v602_v21  ;;  %839 = vmatpush1.msk.msra.mxu0 %vm329_vm0, %v510_v22  ;;  %v595_v36 = vld [vmem:[%s943_s13] sm:$0xff] }
  0x1a   : > { %843 = vmatpush1.msk.msra.mxu1 %vm329_vm0, %v601_v23  ;;  %544 = vmatprep.subr.mxu0 %v509_v24 }
  0x1b   : > { %635 = vmatprep.subr.mxu1 %v600_v25  ;;  %406 = vmatprep.mubr.f32.mxu0 %v872_v0 }
  0x1c   : > { %497 = vmatprep.mubr.f32.mxu1 %v872_v0  ;;  %545 = vmatpush1.msra.mxu0 %v508_v26 }
  0x1d   : > { %636 = vmatpush1.msra.mxu1 %v599_v27  ;;  %833 = vmatmul.mubr.msk.f32.gmra.mxu0 %vm322_vm1, %v313_v28 }
  0x1e   : > { %837 = vmatmul.mubr.msk.f32.gmra.mxu1 %vm322_vm1, %v313_v28  ;;  %546 = vmatprep.subr.mxu0 %v507_v29 }
  0x1f   : > { %637 = vmatprep.subr.mxu1 %v598_v30  ;;  %547 = vmatpush1.msra.mxu0 %v506_v31 }
  0x20   : > { %638 = vmatpush1.msra.mxu1 %v597_v32  ;;  %548 = vmatprep.subr.mxu0 %v505_v33 }
  0x21   : > { %639 = vmatprep.subr.mxu1 %v596_v34  ;;  %549 = vmatpush1.msra.mxu0 %v504_v35 }
  0x22   : > { %582 = vmatprep.mubr.f32.mxu0 %v872_v0  ;;  %640 = vmatpush1.msra.mxu1 %v595_v36 }
  0x23   : > { %673 = vmatprep.mubr.f32.mxu1 %v872_v0  ;;  %840 = vmatmul.mubr.msk.f32.vlgmr.msra.gmra.mxu0 %vm322_vm1, %v312_v19 }
  0x24   : > { %844 = vmatmul.mubr.msk.f32.vlgmr.msra.gmra.mxu1 %vm322_vm1, %v312_v19  ;;  %588 = vmatprep.mubr.f32.mxu0 %v872_v0 }
  0x25   : > { %679 = vmatprep.mubr.f32.mxu1 %v872_v0  ;;  %707 = vperm.xlu0 %863, %v699_v37  }
  0x27   : > { %841 = vmatmul.mubr.msk.f32.gmra.mxu0 %vm322_vm1, %v313_v28 }
  0x28   : > { %845 = vmatmul.mubr.msk.f32.gmra.mxu1 %vm322_vm1, %v313_v28 }
  0x89   : > { %v703_v50 = vpop.permute.xlu0 %702 }
  0xa0   : > { %v708_v5 = vpop.permute.xlu0 %707 }
  0xd7   : > { %v402_v38 = vpop.f32.mrf.mxu0 }
  0xd8   : > { %v493_v39 = vpop.f32.mrf.mxu1 }
  0xd9   : > { %v404_v40 = vpop.f32.mrf.mxu0  ;;  %v686_v48 = vmax.f32 %v402_v38, %v493_v39 }
  0xda   : > { %v495_v41 = vpop.f32.mrf.mxu1 }
  0xdb   : > { %v687_v53 = vmax.f32 %v404_v40, %v495_v41 }
  0xdd   : > { %v408_v42 = vpop.f32.mrf.mxu0 }
  0xde   : > { %v499_v43 = vpop.f32.mrf.mxu1 }
  0xdf   : > { %v410_v44 = vpop.f32.mrf.mxu0  ;;  %v688_v58 = vmax.f32 %v408_v42, %v499_v43 }
  0xe0   : > { %v501_v45 = vpop.f32.mrf.mxu1 }
  0xe1   : > { %v689_v62 = vmax.f32 %v410_v44, %v501_v45 }
  0xe3   : > { %v584_v46 = vpop.f32.mrf.mxu0 }
  0xe4   : > { %v675_v47 = vpop.f32.mrf.mxu1 }
  0xe5   : > { %v690_v49 = vmax.f32 %v584_v46, %v675_v47  ;;  %v586_v51 = vpop.f32.mrf.mxu0 }
  0xe6   : > { %v677_v52 = vpop.f32.mrf.mxu1 }
  0xe7   : > { %v694_v54 = vmax.f32 %v686_v48, %v690_v49  ;;  %v691_v55 = vmax.f32 %v586_v51, %v677_v52  ;;  %v590_v56 = vpop.f32.mrf.mxu0 }
  0xe8   : > { %v681_v57 = vpop.f32.mrf.mxu1 }
  0xe9   : > { %v695_v59 = vmax.f32 %v687_v53, %v691_v55  ;;  %v710_v60 = vadd.f32 %v703_v50, %v694_v54  ;;  %v692_v61 = vmax.f32 %v590_v56, %v681_v57  ;;  %v592_v63 = vpop.f32.mrf.mxu0 }
  0xea   : > { %v683_v0 = vpop.f32.mrf.mxu1 }
  0xeb   : > { %v711_v1 = vadd.f32 %v703_v50, %v695_v59  ;;  %v714_v2 = vmax.f32 %v710_v60, 0.0  ;;  %v693_v3 = vmax.f32 %v592_v63, %v683_v0  ;;  %v696_v4 = vmax.f32 %v688_v58, %v692_v61 }
  0xed   : > { %v715_v6 = vmax.f32 %v711_v1, 0.0  ;;  %718 = vst [vmem:[%s311_s25] sm:$0xff] %v714_v2  ;;  %v697_v7 = vmax.f32 %v689_v62, %v693_v3  ;;  %v712_v8 = vadd.f32 %v708_v5, %v696_v4 }
  0xef   : > { %720 = vst.msk [vmem:[%s311_s25 + $0x8] sm:$0xff] %vm719_vm2, %v715_v6  ;;  %v713_v9 = vadd.f32 %v708_v5, %v697_v7  ;;  %v716_v10 = vmax.f32 %v712_v8, 0.0 }
  0xf1   : > { %v717_v11 = vmax.f32 %v713_v9, 0.0  ;;  %721 = vst [vmem:[%s311_s25 + $0x10] sm:$0x3] %v716_v10 }
  0xf3   : > { %723 = vst.msk [vmem:[%s311_s25 + $0x18] sm:$0x3] %vm722_vm3, %v717_v11 }
  0xf4 PF: > { %s16_s21 = sadd.s32 1, %s870_s21  }
  0xf5   : > { %p13_p4 = scmp.ge.s32.totalorder %s16_s21, 4  }
  0xf7   :  { %15 = sbr.rel (!%p13_p4) target bundleno = 1 (0x1), region = 83 }

// kernel: net_forward.4
= control target key start
LH: loop header
LB: loop body
LE: loop exit
PB: predicated region body
PF: predicated region fallthrough
CT: control target
= control target key end

     0   :  { %s1174_s21 = smov 0   ;;  %s1407_s0 = inlined_call_operand.vmem [shape: f32[2,250,16], index: 0, kind: input, shape index: {}]   ;;  %s1408_s1 = inlined_call_operand.vmem [shape: f32[2,250,16], index: 1, kind: input, shape index: {}]   ;;  %s1409_s2 = inlined_call_operand.vmem [shape: f32[2,250,16], index: 2, kind: input, shape index: {}]   ;;  %s1410_s3 = inlined_call_operand.vmem [shape: f32[2,250,16], index: 3, kind: input, shape index: {}]   ;;  %s1411_s4 = inlined_call_operand.vmem [shape: f32[20,250], index: 4, kind: input, shape index: {}]   ;;  %s1412_s5 = inlined_call_operand.vmem [shape: f32[20,1], index: 5, kind: input, shape index: {}]   ;;  %s1413_s6 = inlined_call_operand.vmem [shape: f32[2,20,16], index: 6, kind: output, shape index: {}]  }
   0x1 LB: > { %s918_s22 = sadd.s32 4294967295, %s1136_s21   ;;  %p922_p0 = scmp.ge.s32.totalorder %s1136_s21, 1  ;;  %s1136_s21 = sphi %s1174_s21, %s16_s21  }
   0x2   : > { %p242_p1 = scmp.lt.s32.totalorder %s1136_s21, 3 }
   0x4   : > { %p243_p2 = pnand %p922_p0, %p242_p1 }
   0x5   : > { %p287_p3 = scmp.lt.s32.totalorder (!%p243_p2), %s918_s22, 1 }
   0x6   : > { %246 = sbr.rel (%p243_p2) target bundleno = 301 (0x12d), region = 44 }
   0xb   : > { %v1185_v0 = vld [vmem:[%s1411_s4 + $0x8] sm:$0xff]  ;;  %vm350_vm0 = vcmask 998400   ;;  %s1415_s22 = smov (!%p287_p3, %s918_s22), 1  ;;  %v1138_v1 = vmov 0   ;;  %v798_v2 = vld [vmem:[%s1412_s5] sm:$0xff]  ;;  %vm360_vm1 = vcmask 1041408  }
   0xc   : > { %933 = vmatprep.mubr.msk.f32.mxu0 %vm350_vm0, %v1185_v0  ;;  %937 = vmatprep.mubr.msk.f32.mxu1 %vm350_vm0, %v1185_v0  ;;  %v800_v3 = vld [vmem:[%s1412_s5 + $0x10] sm:$0xf]  ;;  %s1200_s29 = sshll.u32 %s1415_s22, 8  ;;  %vm822_vm2 = vcmask 130048   ;;  %vm825_vm3 = vcmask 125952  }
   0xd   : > { %1128 = vset.pattern.permute.xlu0 %v1138_v1  ;;  %1129 = vset.pattern.permute.xlu1 %v1138_v1  ;;  %s1206_s8 = scalar_lea.vmem %s1407_s0, %s1200_s29  ;;  %s1212_s11 = scalar_lea.vmem %s1408_s1, %s1200_s29 }
   0xe   : > { %803 = vperm.xlu0 %1128, %v798_v2   ;;  %813 = vperm.xlu1 %1129, %v800_v3   ;;  %v349_v4 = vld [vmem:[%s1206_s8 + $0xf8] sm:$0x3]  ;;  %v348_v8 = vld [vmem:[%s1206_s8 + $0xf0] sm:$0xff]  ;;  %v347_v12 = vld [vmem:[%s1206_s8 + $0xe8] sm:$0xff]  ;;  %s1282_s14 = scalar_lea.vmem %s1409_s2, %s1200_s29  ;;  %s1288_s17 = scalar_lea.vmem %s1410_s3, %s1200_s29 }
   0xf   : > { %v475_v5 = vld [vmem:[%s1212_s11 + $0xf8] sm:$0x3]  ;;  %954 = vmatprep.subr.msk.mxu0 %vm360_vm1, %v349_v4  ;;  %v474_v9 = vld [vmem:[%s1212_s11 + $0xf0] sm:$0xff]  ;;  %v473_v13 = vld [vmem:[%s1212_s11 + $0xe8] sm:$0xff] }
  0x10   : > { %v333_v6 = vld [vmem:[%s1206_s8 + $0x78] sm:$0xff]  ;;  %995 = vmatprep.subr.msk.mxu1 %vm360_vm1, %v475_v5  ;;  %v332_v10 = vld [vmem:[%s1206_s8 + $0x70] sm:$0xff]  ;;  %v331_v14 = vld [vmem:[%s1206_s8 + $0x68] sm:$0xff] }
  0x11   : > { %v459_v7 = vld [vmem:[%s1212_s11 + $0x78] sm:$0xff]  ;;  %955 = vmatpush3.msra.mxu0 %v333_v6  ;;  %v458_v11 = vld [vmem:[%s1212_s11 + $0x70] sm:$0xff]  ;;  %v457_v15 = vld [vmem:[%s1212_s11 + $0x68] sm:$0xff] }
  0x12   : > { %996 = vmatpush3.msra.mxu1 %v459_v7  ;;  %956 = vmatprep.subr.mxu0 %v348_v8  ;;  %v346_v16 = vld [vmem:[%s1206_s8 + $0xe0] sm:$0xff]  ;;  %v345_v20 = vld [vmem:[%s1206_s8 + $0xd8] sm:$0xff]  ;;  %v344_v24 = vld [vmem:[%s1206_s8 + $0xd0] sm:$0xff] }
  0x13   : > { %997 = vmatprep.subr.mxu1 %v474_v9  ;;  %957 = vmatpush3.msra.mxu0 %v332_v10  ;;  %v472_v17 = vld [vmem:[%s1212_s11 + $0xe0] sm:$0xff]  ;;  %v471_v21 = vld [vmem:[%s1212_s11 + $0xd8] sm:$0xff]  ;;  %v470_v25 = vld [vmem:[%s1212_s11 + $0xd0] sm:$0xff] }
  0x14   : > { %998 = vmatpush3.msra.mxu1 %v458_v11  ;;  %958 = vmatprep.subr.mxu0 %v347_v12  ;;  %v330_v18 = vld [vmem:[%s1206_s8 + $0x60] sm:$0xff]  ;;  %v329_v22 = vld [vmem:[%s1206_s8 + $0x58] sm:$0xff]  ;;  %v328_v26 = vld [vmem:[%s1206_s8 + $0x50] sm:$0xff] }
  0x15   : > { %999 = vmatprep.subr.mxu1 %v473_v13  ;;  %v456_v19 = vld [vmem:[%s1212_s11 + $0x60] sm:$0xff]  ;;  %959 = vmatpush3.msra.mxu0 %v331_v14  ;;  %v455_v23 = vld [vmem:[%s1212_s11 + $0x58] sm:$0xff]  ;;  %v454_v27 = vld [vmem:[%s1212_s11 + $0x50] sm:$0xff] }
  0x16   : > { %1000 = vmatpush3.msra.mxu1 %v457_v15  ;;  %960 = vmatprep.subr.mxu0 %v346_v16  ;;  %v343_v28 = vld [vmem:[%s1206_s8 + $0xc8] sm:$0xff]  ;;  %v342_v32 = vld [vmem:[%s1206_s8 + $0xc0] sm:$0xff]  ;;  %v341_v36 = vld [vmem:[%s1206_s8 + $0xb8] sm:$0xff] }
  0x17   : > { %1001 = vmatprep.subr.mxu1 %v472_v17  ;;  %961 = vmatpush3.msra.mxu0 %v330_v18  ;;  %v469_v29 = vld [vmem:[%s1212_s11 + $0xc8] sm:$0xff]  ;;  %v468_v33 = vld [vmem:[%s1212_s11 + $0xc0] sm:$0xff]  ;;  %v467_v37 = vld [vmem:[%s1212_s11 + $0xb8] sm:$0xff] }
  0x18   : > { %1002 = vmatpush3.msra.mxu1 %v456_v19  ;;  %962 = vmatprep.subr.mxu0 %v345_v20  ;;  %v327_v30 = vld [vmem:[%s1206_s8 + $0x48] sm:$0xff]  ;;  %v326_v34 = vld [vmem:[%s1206_s8 + $0x40] sm:$0xff]  ;;  %v325_v38 = vld [vmem:[%s1206_s8 + $0x38] sm:$0xff] }
  0x19   : > { %1003 = vmatprep.subr.mxu1 %v471_v21  ;;  %963 = vmatpush3.msra.mxu0 %v329_v22  ;;  %v453_v31 = vld [vmem:[%s1212_s11 + $0x48] sm:$0xff]  ;;  %v452_v35 = vld [vmem:[%s1212_s11 + $0x40] sm:$0xff]  ;;  %v451_v39 = vld [vmem:[%s1212_s11 + $0x38] sm:$0xff] }
  0x1a   : > { %1004 = vmatpush3.msra.mxu1 %v455_v23  ;;  %964 = vmatprep.subr.mxu0 %v344_v24  ;;  %v340_v40 = vld [vmem:[%s1206_s8 + $0xb0] sm:$0xff]  ;;  %v339_v44 = vld [vmem:[%s1206_s8 + $0xa8] sm:$0xff]  ;;  %v338_v48 = vld [vmem:[%s1206_s8 + $0xa0] sm:$0xff] }
  0x1b   : > { %1005 = vmatprep.subr.mxu1 %v470_v25  ;;  %965 = vmatpush3.msra.mxu0 %v328_v26  ;;  %v466_v41 = vld [vmem:[%s1212_s11 + $0xb0] sm:$0xff]  ;;  %v465_v45 = vld [vmem:[%s1212_s11 + $0xa8] sm:$0xff]  ;;  %v464_v49 = vld [vmem:[%s1212_s11 + $0xa0] sm:$0xff] }
  0x1c   : > { %1006 = vmatpush3.msra.mxu1 %v454_v27  ;;  %966 = vmatprep.subr.mxu0 %v343_v28  ;;  %v324_v42 = vld [vmem:[%s1206_s8 + $0x30] sm:$0xff]  ;;  %v323_v46 = vld [vmem:[%s1206_s8 + $0x28] sm:$0xff]  ;;  %v322_v50 = vld [vmem:[%s1206_s8 + $0x20] sm:$0xff] }
  0x1d   : > { %1007 = vmatprep.subr.mxu1 %v469_v29  ;;  %967 = vmatpush3.msra.mxu0 %v327_v30  ;;  %v450_v43 = vld [vmem:[%s1212_s11 + $0x30] sm:$0xff]  ;;  %v449_v47 = vld [vmem:[%s1212_s11 + $0x28] sm:$0xff]  ;;  %v448_v51 = vld [vmem:[%s1212_s11 + $0x20] sm:$0xff] }
  0x1e   : > { %1008 = vmatpush3.msra.mxu1 %v453_v31  ;;  %968 = vmatprep.subr.mxu0 %v342_v32  ;;  %v337_v52 = vld [vmem:[%s1206_s8 + $0x98] sm:$0xff]  ;;  %v336_v56 = vld [vmem:[%s1206_s8 + $0x90] sm:$0xff]  ;;  %v335_v60 = vld [vmem:[%s1206_s8 + $0x88] sm:$0xff] }
  0x1f   : > { %1009 = vmatprep.subr.mxu1 %v468_v33  ;;  %969 = vmatpush3.msra.mxu0 %v326_v34  ;;  %v463_v53 = vld [vmem:[%s1212_s11 + $0x98] sm:$0xff]  ;;  %v462_v57 = vld [vmem:[%s1212_s11 + $0x90] sm:$0xff]  ;;  %v461_v61 = vld [vmem:[%s1212_s11 + $0x88] sm:$0xff] }
  0x20   : > { %1010 = vmatpush3.msra.mxu1 %v452_v35  ;;  %970 = vmatprep.subr.mxu0 %v341_v36  ;;  %v321_v54 = vld [vmem:[%s1206_s8 + $0x18] sm:$0xff]  ;;  %v320_v58 = vld [vmem:[%s1206_s8 + $0x10] sm:$0xff]  ;;  %v319_v62 = vld [vmem:[%s1206_s8 + $0x8] sm:$0xff] }
  0x21   : > { %1011 = vmatprep.subr.mxu1 %v467_v37  ;;  %971 = vmatpush3.msra.mxu0 %v325_v38  ;;  %v447_v55 = vld [vmem:[%s1212_s11 + $0x18] sm:$0xff]  ;;  %v446_v59 = vld [vmem:[%s1212_s11 + $0x10] sm:$0xff]  ;;  %v445_v63 = vld [vmem:[%s1212_s11 + $0x8] sm:$0xff] }
  0x22   : > { %1012 = vmatpush3.msra.mxu1 %v451_v39  ;;  %972 = vmatprep.subr.mxu0 %v340_v40  ;;  %v334_v1 = vld [vmem:[%s1206_s8 + $0x80] sm:$0xff]  ;;  %v590_v6 = vld [vmem:[%s1282_s14 + $0xf8] sm:$0x3]  ;;  %v589_v10 = vld [vmem:[%s1282_s14 + $0xf0] sm:$0xff] }
  0x23   : > { %1013 = vmatprep.subr.mxu1 %v466_v41  ;;  %973 = vmatpush3.msra.mxu0 %v324_v42  ;;  %v460_v2 = vld [vmem:[%s1212_s11 + $0x80] sm:$0xff]  ;;  %v705_v7 = vld [vmem:[%s1288_s17 + $0xf8] sm:$0x3]  ;;  %v704_v11 = vld [vmem:[%s1288_s17 + $0xf0] sm:$0xff] }
  0x24   : > { %1014 = vmatpush3.msra.mxu1 %v450_v43  ;;  %974 = vmatprep.subr.mxu0 %v339_v44  ;;  %v318_v3 = vld [vmem:[%s1206_s8] sm:$0xff]  ;;  %v574_v8 = vld [vmem:[%s1282_s14 + $0x78] sm:$0xff]  ;;  %v573_v12 = vld [vmem:[%s1282_s14 + $0x70] sm:$0xff]  ;;  %s1118_s8 = smul.u32 24, %s1415_s22 }
  0x25   : > { %1015 = vmatprep.subr.mxu1 %v465_v45  ;;  %975 = vmatpush3.msra.mxu0 %v323_v46  ;;  %v444_v4 = vld [vmem:[%s1212_s11] sm:$0xff]  ;;  %v689_v9 = vld [vmem:[%s1288_s17 + $0x78] sm:$0xff]  ;;  %v688_v13 = vld [vmem:[%s1288_s17 + $0x70] sm:$0xff] }
  0x26   : > { %1016 = vmatpush3.msra.mxu1 %v449_v47  ;;  %976 = vmatprep.subr.mxu0 %v338_v48  ;;  %v1295_v5 = vld [vmem:[%s1411_s4] sm:$0xff]  ;;  %v588_v14 = vld [vmem:[%s1282_s14 + $0xe8] sm:$0xff]  ;;  %v586_v22 = vld [vmem:[%s1282_s14 + $0xd8] sm:$0xff]  ;;  %s311_s11 = scalar_lea.vmem %s1413_s6, %s1118_s8 }
  0x27   : > { %1017 = vmatprep.subr.mxu1 %v464_v49  ;;  %977 = vmatpush3.msra.mxu0 %v322_v50  ;;  %v703_v15 = vld [vmem:[%s1288_s17 + $0xe8] sm:$0xff]  ;;  %v587_v18 = vld [vmem:[%s1282_s14 + $0xe0] sm:$0xff]  ;;  %v701_v23 = vld [vmem:[%s1288_s17 + $0xd8] sm:$0xff] }
  0x28   : > { %1018 = vmatpush3.msra.mxu1 %v448_v51  ;;  %978 = vmatprep.subr.mxu0 %v337_v52  ;;  %v572_v16 = vld [vmem:[%s1282_s14 + $0x68] sm:$0xff]  ;;  %v702_v19 = vld [vmem:[%s1288_s17 + $0xe0] sm:$0xff]  ;;  %v570_v24 = vld [vmem:[%s1282_s14 + $0x58] sm:$0xff] }
  0x29   : > { %1019 = vmatprep.subr.mxu1 %v463_v53  ;;  %979 = vmatpush3.msra.mxu0 %v321_v54  ;;  %v687_v17 = vld [vmem:[%s1288_s17 + $0x68] sm:$0xff]  ;;  %v571_v20 = vld [vmem:[%s1282_s14 + $0x60] sm:$0xff]  ;;  %v685_v25 = vld [vmem:[%s1288_s17 + $0x58] sm:$0xff] }
  0x2a   : > { %1020 = vmatpush3.msra.mxu1 %v447_v55  ;;  %980 = vmatprep.subr.mxu0 %v336_v56  ;;  %v686_v21 = vld [vmem:[%s1288_s17 + $0x60] sm:$0xff]  ;;  %v585_v26 = vld [vmem:[%s1282_s14 + $0xd0] sm:$0xff]  ;;  %v584_v30 = vld [vmem:[%s1282_s14 + $0xc8] sm:$0xff] }
  0x2b   : > { %1021 = vmatprep.subr.mxu1 %v462_v57  ;;  %981 = vmatpush3.msra.mxu0 %v320_v58  ;;  %v700_v27 = vld [vmem:[%s1288_s17 + $0xd0] sm:$0xff]  ;;  %v699_v31 = vld [vmem:[%s1288_s17 + $0xc8] sm:$0xff]  ;;  %v583_v34 = vld [vmem:[%s1282_s14 + $0xc0] sm:$0xff] }
  0x2c   : > { %1022 = vmatpush3.msra.mxu1 %v446_v59  ;;  %982 = vmatprep.subr.mxu0 %v335_v60  ;;  %v569_v28 = vld [vmem:[%s1282_s14 + $0x50] sm:$0xff]  ;;  %v568_v32 = vld [vmem:[%s1282_s14 + $0x48] sm:$0xff]  ;;  %v698_v35 = vld [vmem:[%s1288_s17 + $0xc0] sm:$0xff] }
  0x2d   : > { %1023 = vmatprep.subr.mxu1 %v461_v61  ;;  %983 = vmatpush3.msra.mxu0 %v319_v62  ;;  %v684_v29 = vld [vmem:[%s1288_s17 + $0x50] sm:$0xff]  ;;  %v683_v33 = vld [vmem:[%s1288_s17 + $0x48] sm:$0xff]  ;;  %v567_v36 = vld [vmem:[%s1282_s14 + $0x40] sm:$0xff] }
  0x2e   : > { %1024 = vmatpush3.msra.mxu1 %v445_v63  ;;  %984 = vmatprep.subr.mxu0 %v334_v1  ;;  %v682_v37 = vld [vmem:[%s1288_s17 + $0x40] sm:$0xff]  ;;  %v582_v38 = vld [vmem:[%s1282_s14 + $0xb8] sm:$0xff]  ;;  %v581_v42 = vld [vmem:[%s1282_s14 + $0xb0] sm:$0xff] }
  0x2f   : > { %1025 = vmatprep.subr.mxu1 %v460_v2  ;;  %985 = vmatpush3.msra.mxu0 %v318_v3  ;;  %v697_v39 = vld [vmem:[%s1288_s17 + $0xb8] sm:$0xff]  ;;  %v696_v43 = vld [vmem:[%s1288_s17 + $0xb0] sm:$0xff]  ;;  %v580_v46 = vld [vmem:[%s1282_s14 + $0xa8] sm:$0xff] }
  0x30   : > { %1026 = vmatpush3.msra.mxu1 %v444_v4  ;;  %429 = vmatmul.mubr.f32.vlgmr.msra.gmra.mxu0 %v1295_v5  ;;  %v566_v40 = vld [vmem:[%s1282_s14 + $0x38] sm:$0xff]  ;;  %v565_v44 = vld [vmem:[%s1282_s14 + $0x30] sm:$0xff]  ;;  %v695_v47 = vld [vmem:[%s1288_s17 + $0xa8] sm:$0xff] }
  0x31   : > { %544 = vmatmul.mubr.f32.vlgmr.msra.gmra.mxu1 %v1295_v5  ;;  %1036 = vmatprep.subr.msk.mxu0 %vm360_vm1, %v590_v6  ;;  %v681_v41 = vld [vmem:[%s1288_s17 + $0x38] sm:$0xff]  ;;  %v680_v45 = vld [vmem:[%s1288_s17 + $0x30] sm:$0xff]  ;;  %v564_v49 = vld [vmem:[%s1282_s14 + $0x28] sm:$0xff] }
  0x32   : > { %1077 = vmatprep.subr.msk.mxu1 %vm360_vm1, %v705_v7  ;;  %1037 = vmatpush3.msra.mxu0 %v574_v8  ;;  %v1346_v48 = vld [vmem:[%s1411_s4 + $0x18] sm:$0xff]  ;;  %v679_v50 = vld [vmem:[%s1288_s17 + $0x28] sm:$0xff]  ;;  %v314_v51 = vld [vmem:[%s1411_s4 + $0x10] sm:$0xff] }
  0x33   : > { %1078 = vmatpush3.msra.mxu1 %v689_v9  ;;  %1038 = vmatprep.subr.mxu0 %v589_v10  ;;  %v579_v52 = vld [vmem:[%s1282_s14 + $0xa0] sm:$0xff]  ;;  %v578_v56 = vld [vmem:[%s1282_s14 + $0x98] sm:$0xff]  ;;  %v317_v58 = vld [vmem:[%s1411_s4 + $0x28] sm:$0xf] }
  0x34   : > { %1079 = vmatprep.subr.mxu1 %v704_v11  ;;  %1039 = vmatpush3.msra.mxu0 %v573_v12  ;;  %v694_v53 = vld [vmem:[%s1288_s17 + $0xa0] sm:$0xff]  ;;  %v693_v57 = vld [vmem:[%s1288_s17 + $0x98] sm:$0xff]  ;;  %v577_v62 = vld [vmem:[%s1282_s14 + $0x90] sm:$0xff] }
  0x35   : > { %1080 = vmatpush3.msra.mxu1 %v688_v13  ;;  %1040 = vmatprep.subr.mxu0 %v588_v14  ;;  %v563_v54 = vld [vmem:[%s1282_s14 + $0x20] sm:$0xff]  ;;  %v562_v59 = vld [vmem:[%s1282_s14 + $0x18] sm:$0xff]  ;;  %v692_v63 = vld [vmem:[%s1288_s17 + $0x90] sm:$0xff] }
  0x36   : > { %1081 = vmatprep.subr.mxu1 %v703_v15  ;;  %1041 = vmatpush3.msra.mxu0 %v572_v16  ;;  %v678_v55 = vld [vmem:[%s1288_s17 + $0x20] sm:$0xff]  ;;  %v677_v60 = vld [vmem:[%s1288_s17 + $0x18] sm:$0xff]  ;;  %v561_v1 = vld [vmem:[%s1282_s14 + $0x10] sm:$0xff] }
  0x37   : > { %1082 = vmatpush3.msra.mxu1 %v687_v17  ;;  %1042 = vmatprep.subr.mxu0 %v587_v18  ;;  %v316_v61 = vld [vmem:[%s1411_s4 + $0x20] sm:$0xf]  ;;  %v676_v2 = vld [vmem:[%s1288_s17 + $0x10] sm:$0xff]  ;;  %v576_v3 = vld [vmem:[%s1282_s14 + $0x88] sm:$0xff] }
  0x38   : > { %1083 = vmatprep.subr.mxu1 %v702_v19  ;;  %1043 = vmatpush3.msra.mxu0 %v571_v20  ;;  %v691_v4 = vld [vmem:[%s1288_s17 + $0x88] sm:$0xff]  ;;  %v575_v8 = vld [vmem:[%s1282_s14 + $0x80] sm:$0xff] }
  0x39   : > { %1084 = vmatpush3.msra.mxu1 %v686_v21  ;;  %1044 = vmatprep.subr.mxu0 %v586_v22  ;;  %v560_v6 = vld [vmem:[%s1282_s14 + $0x8] sm:$0xff]  ;;  %v690_v9 = vld [vmem:[%s1288_s17 + $0x80] sm:$0xff] }
  0x3a   : > { %1085 = vmatprep.subr.mxu1 %v701_v23  ;;  %1045 = vmatpush3.msra.mxu0 %v570_v24  ;;  %v675_v7 = vld [vmem:[%s1288_s17 + $0x8] sm:$0xff]  ;;  %v559_v10 = vld [vmem:[%s1282_s14] sm:$0xff] }
  0x3b   : > { %1086 = vmatpush3.msra.mxu1 %v685_v25  ;;  %1046 = vmatprep.subr.mxu0 %v585_v26  ;;  %v674_v11 = vld [vmem:[%s1288_s17] sm:$0xff]  ;;  %v799_v12 = vld [vmem:[%s1412_s5 + $0x8] sm:$0xff] }
  0x3c   : > { %1087 = vmatprep.subr.mxu1 %v700_v27  ;;  %1047 = vmatpush3.msra.mxu0 %v569_v28 }
  0x3d   : > { %1088 = vmatpush3.msra.mxu1 %v684_v29  ;;  %1048 = vmatprep.subr.mxu0 %v584_v30 }
  0x3e   : > { %1089 = vmatprep.subr.mxu1 %v699_v31  ;;  %1049 = vmatpush3.msra.mxu0 %v568_v32 }
  0x3f   : > { %1090 = vmatpush3.msra.mxu1 %v683_v33  ;;  %1050 = vmatprep.subr.mxu0 %v583_v34 }
  0x40   : > { %1091 = vmatprep.subr.mxu1 %v698_v35  ;;  %1051 = vmatpush3.msra.mxu0 %v567_v36 }
  0x41   : > { %1092 = vmatpush3.msra.mxu1 %v682_v37  ;;  %1052 = vmatprep.subr.mxu0 %v582_v38 }
  0x42   : > { %1093 = vmatprep.subr.mxu1 %v697_v39  ;;  %1053 = vmatpush3.msra.mxu0 %v566_v40 }
  0x43   : > { %1094 = vmatpush3.msra.mxu1 %v681_v41  ;;  %1054 = vmatprep.subr.mxu0 %v581_v42 }
  0x44   : > { %1095 = vmatprep.subr.mxu1 %v696_v43  ;;  %1055 = vmatpush3.msra.mxu0 %v565_v44 }
  0x45   : > { %1096 = vmatpush3.msra.mxu1 %v680_v45  ;;  %1056 = vmatprep.subr.mxu0 %v580_v46 }
  0x46   : > { %1097 = vmatprep.subr.mxu1 %v695_v47  ;;  %934 = vmatprep.mubr.msk.f32.mxu0 %vm350_vm0, %v1346_v48 }
  0x47   : > { %938 = vmatprep.mubr.msk.f32.mxu1 %vm350_vm0, %v1346_v48  ;;  %1057 = vmatpush3.msra.mxu0 %v564_v49 }
  0x48   : > { %1098 = vmatpush3.msra.mxu1 %v679_v50  ;;  %434 = vmatmul.mubr.f32.gmra.mxu0 %v314_v51 }
  0x49   : > { %549 = vmatmul.mubr.f32.gmra.mxu1 %v314_v51  ;;  %1058 = vmatprep.subr.mxu0 %v579_v52 }
  0x4a   : > { %1099 = vmatprep.subr.mxu1 %v694_v53  ;;  %1059 = vmatpush3.msra.mxu0 %v563_v54 }
  0x4b   : > { %1100 = vmatpush3.msra.mxu1 %v678_v55  ;;  %1060 = vmatprep.subr.mxu0 %v578_v56 }
  0x4c   : > { %1101 = vmatprep.subr.mxu1 %v693_v57  ;;  %935 = vmatprep.mubr.msk.f32.mxu0 %vm350_vm0, %v317_v58 }
  0x4d   : > { %939 = vmatprep.mubr.msk.f32.mxu1 %vm350_vm0, %v317_v58  ;;  %1061 = vmatpush3.msra.mxu0 %v562_v59 }
  0x4e   : > { %1102 = vmatpush3.msra.mxu1 %v677_v60  ;;  %439 = vmatmul.mubr.f32.gmra.mxu0 %v316_v61 }
  0x4f   : > { %554 = vmatmul.mubr.f32.gmra.mxu1 %v316_v61  ;;  %1062 = vmatprep.subr.mxu0 %v577_v62 }
  0x50   : > { %1103 = vmatprep.subr.mxu1 %v692_v63  ;;  %1063 = vmatpush3.msra.mxu0 %v561_v1 }
  0x51   : > { %1104 = vmatpush3.msra.mxu1 %v676_v2  ;;  %1064 = vmatprep.subr.mxu0 %v576_v3 }
  0x52   : > { %1105 = vmatprep.subr.mxu1 %v691_v4  ;;  %1065 = vmatpush3.msra.mxu0 %v560_v6 }
  0x53   : > { %1106 = vmatpush3.msra.mxu1 %v675_v7  ;;  %1066 = vmatprep.subr.mxu0 %v575_v8 }
  0x54   : > { %1107 = vmatprep.subr.mxu1 %v690_v9  ;;  %1067 = vmatpush3.msra.mxu0 %v559_v10 }
  0x55   : > { %941 = vmatprep.mubr.msk.f32.mxu0 %vm350_vm0, %v1185_v0  ;;  %1108 = vmatpush3.msra.mxu1 %v674_v11 }
  0x56   : > { %945 = vmatprep.mubr.msk.f32.mxu1 %vm350_vm0, %v1185_v0  ;;  %659 = vmatmul.mubr.f32.vlgmr.msra.gmra.mxu0 %v1295_v5 }
  0x57   : > { %774 = vmatmul.mubr.f32.vlgmr.msra.gmra.mxu1 %v1295_v5  ;;  %942 = vmatprep.mubr.msk.f32.mxu0 %vm350_vm0, %v1346_v48 }
  0x58   : > { %946 = vmatprep.mubr.msk.f32.mxu1 %vm350_vm0, %v1346_v48  ;;  %808 = vperm.xlu0 %1128, %v799_v12  }
  0x5a   : > { %664 = vmatmul.mubr.f32.gmra.mxu0 %v314_v51 }
  0x5b   : > { %779 = vmatmul.mubr.f32.gmra.mxu1 %v314_v51  ;;  %943 = vmatprep.mubr.msk.f32.mxu0 %vm350_vm0, %v317_v58 }
  0x5c   : > { %947 = vmatprep.mubr.msk.f32.mxu1 %vm350_vm0, %v317_v58 }
  0x5e   : > { %669 = vmatmul.mubr.f32.gmra.mxu0 %v316_v61 }
  0x5f   : > { %784 = vmatmul.mubr.f32.gmra.mxu1 %v316_v61 }
  0x89   : > { %v804_v31 = vpop.permute.xlu0 %803  ;;  %v814_v60 = vpop.permute.xlu1 %813 }
  0xd3   : > { %v809_v50 = vpop.permute.xlu0 %808 }
  0xf0   : > { %v986_v0 = vpop.f32.mrf.mxu0 }
  0xf1   : > { %v1027_v13 = vpop.f32.mrf.mxu1 }
  0xf2   : > { %v987_v14 = vpop.f32.mrf.mxu0 }
  0xf3   : > { %v1028_v15 = vpop.f32.mrf.mxu1  ;;  %v988_v25 = vadd.f32 %v987_v14, %v986_v0 }
  0xf4   : > { %v1029_v26 = vadd.f32 %v1028_v15, %v1027_v13 }
  0xf6   : > { %v789_v36 = vmax.f32 %v988_v25, %v1029_v26 }
 0x108   : > { %v989_v5 = vpop.f32.mrf.mxu0 }
 0x109   : > { %v1030_v16 = vpop.f32.mrf.mxu1 }
 0x10a   : > { %v990_v17 = vpop.f32.mrf.mxu0 }
 0x10b   : > { %v1031_v18 = vpop.f32.mrf.mxu1  ;;  %v991_v32 = vadd.f32 %v990_v17, %v989_v5 }
 0x10c   : > { %v1032_v33 = vadd.f32 %v1031_v18, %v1030_v16 }
 0x10e   : > { %v992_v19 = vpop.f32.mrf.mxu0  ;;  %v790_v43 = vmax.f32 %v991_v32, %v1032_v33 }
 0x10f   : > { %v1033_v20 = vpop.f32.mrf.mxu1 }
 0x110   : > { %v993_v21 = vpop.f32.mrf.mxu0 }
 0x111   : > { %v1034_v22 = vpop.f32.mrf.mxu1  ;;  %v994_v46 = vadd.f32 %v993_v21, %v992_v19 }
 0x112   : > { %v1035_v47 = vadd.f32 %v1034_v22, %v1033_v20 }
 0x114   : > { %v791_v57 = vmax.f32 %v994_v46, %v1035_v47 }
 0x116   : > { %v1068_v23 = vpop.f32.mrf.mxu0 }
 0x117   : > { %v1109_v24 = vpop.f32.mrf.mxu1 }
 0x118   : > { %v1069_v27 = vpop.f32.mrf.mxu0 }
 0x119   : > { %v1110_v28 = vpop.f32.mrf.mxu1  ;;  %v1070_v29 = vadd.f32 %v1069_v27, %v1068_v23 }
 0x11a   : > { %v1111_v30 = vadd.f32 %v1110_v28, %v1109_v24  ;;  %v1071_v34 = vpop.f32.mrf.mxu0 }
 0x11b   : > { %v1112_v35 = vpop.f32.mrf.mxu1 }
 0x11c   : > { %v792_v37 = vmax.f32 %v1070_v29, %v1111_v30  ;;  %v1072_v38 = vpop.f32.mrf.mxu0 }
 0x11d   : > { %v1113_v39 = vpop.f32.mrf.mxu1  ;;  %v1073_v40 = vadd.f32 %v1072_v38, %v1071_v34 }
 0x11e   : > { %v1114_v41 = vadd.f32 %v1113_v39, %v1112_v35  ;;  %v795_v42 = vmax.f32 %v789_v36, %v792_v37  ;;  %v1074_v44 = vpop.f32.mrf.mxu0 }
 0x11f   : > { %v1115_v45 = vpop.f32.mrf.mxu1 }
 0x120   : > { %v793_v48 = vmax.f32 %v1073_v40, %v1114_v41  ;;  %v816_v49 = vadd.f32 %v804_v31, %v795_v42  ;;  %v1075_v51 = vpop.f32.mrf.mxu0 }
 0x121   : > { %v1116_v52 = vpop.f32.mrf.mxu1  ;;  %v1076_v54 = vadd.f32 %v1075_v51, %v1074_v44 }
 0x122   : > { %v819_v53 = vmax.f32 %v816_v49, 0.0  ;;  %v1117_v55 = vadd.f32 %v1116_v52, %v1115_v45  ;;  %v796_v56 = vmax.f32 %v790_v43, %v793_v48 }
 0x124   : > { %823 = vst.msk [vmem:[%s311_s11] sm:$0xff] %vm822_vm2, %v819_v53  ;;  %v794_v58 = vmax.f32 %v1076_v54, %v1117_v55  ;;  %v817_v59 = vadd.f32 %v809_v50, %v796_v56 }
 0x126   : > { %v820_v61 = vmax.f32 %v817_v59, 0.0  ;;  %v797_v62 = vmax.f32 %v791_v57, %v794_v58 }
 0x128   : > { %824 = vst.msk [vmem:[%s311_s11 + $0x8] sm:$0xff] %vm822_vm2, %v820_v61  ;;  %v818_v63 = vadd.f32 %v814_v60, %v797_v62 }
 0x12a   : > { %v821_v1 = vmax.f32 %v818_v63, 0.0 }
 0x12c   : > { %826 = vst.msk [vmem:[%s311_s11 + $0x10] sm:$0xf] %vm825_vm3, %v821_v1 }
 0x12d PF: > { %s16_s21 = sadd.s32 1, %s1136_s21  }
 0x12e   : > { %p13_p4 = scmp.ge.s32.totalorder %s16_s21, 4  }
 0x130   :  { %15 = sbr.rel (!%p13_p4) target bundleno = 1 (0x1), region = 83 }

// kernel: net_forward.5
= control target key start
LH: loop header
LB: loop body
LE: loop exit
PB: predicated region body
PF: predicated region fallthrough
CT: control target
= control target key end

     0   :  { %v460_v4 = vmov 0.0   ;;  %v461_v5 = vmov 1983009808   ;;  %v74_v7 = vlaneseq  ;;  %vm462_vm0 = vmmov 0   ;;  %s666_s0 = inlined_call_operand.vmem [shape: f32[2,320], index: 0, kind: input, shape index: {}]   ;;  %s667_s1 = inlined_call_operand.vmem [shape: f32[320,50], index: 1, kind: input, shape index: {}]   ;;  %s668_s2 = inlined_call_operand.vmem [shape: f32[1,50], index: 2, kind: input, shape index: {}]   ;;  %s669_s3 = inlined_call_operand.vmem [shape: f32[50,10], index: 3, kind: input, shape index: {}]   ;;  %s670_s4 = inlined_call_operand.vmem [shape: f32[1,10], index: 4, kind: input, shape index: {}]   ;;  %s671_s5 = inlined_call_operand.hbm [shape: f32[2,10], index: 5, kind: output, shape index: {}]  }
   0x1   :  { %v53_v0 = vld [vmem:[%s667_s1 + $0xf8] sm:$0xff]  ;;  %v52_v2 = vld [vmem:[%s667_s1 + $0xf0] sm:$0xff]  ;;  %397 = vmatprep.subr.mxu1 %v460_v4  ;;  %v72_v6 = vunpack.c.l.s4 %v461_v5  ;;  %v51_v8 = vld [vmem:[%s667_s1 + $0xe8] sm:$0xff]  ;;  %413 = vmatprep.mubr.msk.f32.mxu1 %vm462_vm0, %v460_v4 }
   0x2   :  { %v37_v1 = vld [vmem:[%s667_s1 + $0x78] sm:$0xff]  ;;  %345 = vmatprep.subr.mxu0 %v53_v0  ;;  %v36_v3 = vld [vmem:[%s667_s1 + $0x70] sm:$0xff]  ;;  %v35_v9 = vld [vmem:[%s667_s1 + $0x68] sm:$0xff]  ;;  %v75_v13 = vshrl.u32 %v74_v7, 7 }
   0x3   :  { %346 = vmatpush3.msra.mxu0 %v37_v1  ;;  %v50_v10 = vld [vmem:[%s667_s1 + $0xe0] sm:$0xff]  ;;  %v73_v12 = vunpack.c.0.s8 %v72_v6  ;;  %v49_v14 = vld [vmem:[%s667_s1 + $0xd8] sm:$0xff]  ;;  %v48_v17 = vld [vmem:[%s667_s1 + $0xd0] sm:$0xff] }
   0x4   :  { %347 = vmatprep.subr.mxu0 %v52_v2  ;;  %v34_v11 = vld [vmem:[%s667_s1 + $0x60] sm:$0xff]  ;;  %v33_v15 = vld [vmem:[%s667_s1 + $0x58] sm:$0xff]  ;;  %v60_v18 = vld [vmem:[%s667_s1 + $0x130] sm:$0xff] }
   0x5   :  { %348 = vmatpush3.msra.mxu0 %v36_v3  ;;  %v61_v16 = vld [vmem:[%s667_s1 + $0x138] sm:$0xff]  ;;  %v32_v19 = vld [vmem:[%s667_s1 + $0x50] sm:$0xff]  ;;  %v59_v20 = vld [vmem:[%s667_s1 + $0x128] sm:$0xff]  ;;  %v76_v21 = vsub.s32 %v73_v12, %v75_v13 }
   0x6   :  { %349 = vmatprep.subr.mxu0 %v51_v8  ;;  %398 = vmatpush3.msra.mxu1 %v61_v16  ;;  %v47_v22 = vld [vmem:[%s667_s1 + $0xc8] sm:$0xff]  ;;  %v58_v24 = vld [vmem:[%s667_s1 + $0x120] sm:$0xff]  ;;  %v57_v28 = vld [vmem:[%s667_s1 + $0x118] sm:$0xff] }
   0x7   :  { %350 = vmatpush3.msra.mxu0 %v35_v9  ;;  %399 = vmatprep.subr.mxu1 %v460_v4  ;;  %v31_v23 = vld [vmem:[%s667_s1 + $0x48] sm:$0xff]  ;;  %v46_v25 = vld [vmem:[%s667_s1 + $0xc0] sm:$0xff]  ;;  %v45_v30 = vld [vmem:[%s667_s1 + $0xb8] sm:$0xff] }
   0x8   :  { %351 = vmatprep.subr.mxu0 %v50_v10  ;;  %400 = vmatpush3.msra.mxu1 %v60_v18  ;;  %v21_v26 = vld [vmem:[%s666_s0] sm:$0x3f] }
   0x9   :  { %352 = vmatpush3.msra.mxu0 %v34_v11  ;;  %401 = vmatprep.subr.mxu1 %v460_v4  ;;  %v30_v27 = vld [vmem:[%s667_s1 + $0x40] sm:$0xff]  ;;  %v77_v29 = vrot.slane %v21_v26, %v76_v21 }
   0xa   :  { %353 = vmatprep.subr.mxu0 %v49_v14  ;;  %402 = vmatpush3.msra.mxu1 %v59_v20 }
   0xb   :  { %354 = vmatpush3.msra.mxu0 %v33_v15  ;;  %403 = vmatprep.subr.mxu1 %v460_v4 }
   0xc   :  { %355 = vmatprep.subr.mxu0 %v48_v17  ;;  %404 = vmatpush3.msra.mxu1 %v58_v24 }
   0xd   :  { %356 = vmatpush3.msra.mxu0 %v32_v19 }
   0xe   :  { %357 = vmatprep.subr.mxu0 %v47_v22 }
   0xf   :  { %358 = vmatpush3.msra.mxu0 %v31_v23 }
  0x10   :  { %10 = vsyncpa [#allocation3], 0  ;;  %359 = vmatprep.subr.mxu0 %v46_v25  ;;  %v29_v31 = vld [vmem:[%s667_s1 + $0x38] sm:$0xff]  ;;  %405 = vmatprep.subr.mxu1 %v460_v4  ;;  %v85_v32 = vcombine.high %v77_v29, %v77_v29  ;;  %v44_v33 = vld [vmem:[%s667_s1 + $0xb0] sm:$0xff]  ;;  %v70_v34 = vcombine.high %v21_v26, %v21_v26  ;;  %vm88_vm1 = vcmask 523264   ;;  %vm250_vm2 = vcmask 1041408  }
  0x11   :  { %360 = vmatpush3.msra.mxu0 %v30_v27  ;;  %406 = vmatpush3.msra.mxu1 %v57_v28  ;;  %v56_v35 = vld [vmem:[%s667_s1 + $0x110] sm:$0xff]  ;;  %v43_v37 = vld [vmem:[%s667_s1 + $0xa8] sm:$0xff]  ;;  %v42_v40 = vld [vmem:[%s667_s1 + $0xa0] sm:$0xff]  ;;  %vm246_vm3 = vcmask 408576   ;;  %vm324_vm4 = vcmask 74752  }
  0x12   :  { %361 = vmatprep.subr.mxu0 %v45_v30  ;;  %v28_v36 = vld [vmem:[%s667_s1 + $0x30] sm:$0xff]  ;;  %407 = vmatprep.subr.mxu1 %v460_v4  ;;  %v55_v38 = vld [vmem:[%s667_s1 + $0x108] sm:$0xff]  ;;  %v84_v41 = vrot.slane %v70_v34, %v76_v21  ;;  %v54_v42 = vld [vmem:[%s667_s1 + $0x100] sm:$0xff] }
  0x13   :  { %362 = vmatpush3.msra.mxu0 %v29_v31  ;;  %155 = vmatprep.mubr.f32.mxu0 %v85_v32  ;;  %v27_v39 = vld [vmem:[%s667_s1 + $0x28] sm:$0xff]  ;;  %v26_v43 = vld [vmem:[%s667_s1 + $0x20] sm:$0xff]  ;;  %v41_v44 = vld [vmem:[%s667_s1 + $0x98] sm:$0xff] }
  0x14   :  { %363 = vmatprep.subr.mxu0 %v44_v33  ;;  %408 = vmatpush3.msra.mxu1 %v56_v35  ;;  %v25_v45 = vld [vmem:[%s667_s1 + $0x18] sm:$0xff]  ;;  %v238_v46 = vld [vmem:[%s669_s3 + $0x30] sm:$0x3]  ;;  %v39_v49 = vld [vmem:[%s667_s1 + $0x88] sm:$0xff] }
  0x15   :  { %364 = vmatpush3.msra.mxu0 %v28_v36  ;;  %409 = vmatprep.subr.mxu1 %v460_v4  ;;  %v40_v47 = vld [vmem:[%s667_s1 + $0x90] sm:$0xff]  ;;  %v23_v50 = vld [vmem:[%s667_s1 + $0x8] sm:$0xff]  ;;  %v38_v51 = vld [vmem:[%s667_s1 + $0x80] sm:$0xff] }
  0x16   :  { %365 = vmatprep.subr.mxu0 %v43_v37  ;;  %410 = vmatpush3.msra.mxu1 %v55_v38  ;;  %v24_v48 = vld [vmem:[%s667_s1 + $0x10] sm:$0xff]  ;;  %v22_v52 = vld [vmem:[%s667_s1] sm:$0xff]  ;;  %v237_v53 = vld [vmem:[%s669_s3 + $0x28] sm:$0xff] }
  0x17   :  { %366 = vmatpush3.msra.mxu0 %v27_v39  ;;  %411 = vmatprep.subr.mxu1 %v460_v4  ;;  %v236_v54 = vld [vmem:[%s669_s3 + $0x20] sm:$0xff]  ;;  %v235_v55 = vld [vmem:[%s669_s3 + $0x18] sm:$0xff]  ;;  %v234_v56 = vld [vmem:[%s669_s3 + $0x10] sm:$0xff] }
  0x18   :  { %367 = vmatprep.subr.mxu0 %v42_v40  ;;  %412 = vmatpush3.msra.mxu1 %v54_v42  ;;  %v233_v57 = vld [vmem:[%s669_s3 + $0x8] sm:$0xff]  ;;  %v232_v58 = vld [vmem:[%s669_s3] sm:$0xff]  ;;  %s463_s3 = smov [#allocation2]  }
  0x19   :  { %368 = vmatpush3.msra.mxu0 %v26_v43  ;;  %414 = vmatmul.mubr.msk.f32.vlgmr.msra.gmra.mxu1 %vm88_vm1, %v84_v41  ;;  %v340_v63 = vld [vmem:[%s668_s2] ss:$0 sm:$0xff]  ;;  %s332_s14 = sshll.u32 %s463_s3, 4  ;;  %s333_s14 = int_to_ptr.vmem [resolvable:$true] %s332_s14 }
  0x1a   :  { %369 = vmatprep.subr.mxu0 %v41_v44  ;;  %416 = vmatprep.subr.mxu1 %v460_v4  ;;  %s438_s15 = scalar_lea.vmem %s333_s14, 32  ;;  %p443_p1 = scmp.lt.s32.totalorder %s333_s14, %s333_s14 }
  0x1b   :  { %370 = vmatpush3.msra.mxu0 %v25_v45  ;;  %417 = vmatpush3.msk.msra.mxu1 %vm250_vm2, %v238_v46  ;;  %p439_p0 = scmp.ne.s32.totalorder %s333_s14, %s438_s15  ;;  %p444_p2 = scmp.lt.s32.totalorder %s438_s15, %s438_s15 }
  0x1c   :  { %371 = vmatprep.subr.mxu0 %v40_v47  ;;  %418 = vmatprep.subr.mxu1 %v460_v4 }
  0x1d   :  { %372 = vmatpush3.msra.mxu0 %v24_v48  ;;  %430 = vmatprep.mubr.msk.f32.mxu1 %vm462_vm0, %v460_v4  ;;  %p445_p3 = por %p444_p2, %p443_p1 }
  0x1e   :  { %373 = vmatprep.subr.mxu0 %v39_v49  ;;  %419 = vmatpush3.msra.mxu1 %v237_v53 }
  0x1f   :  { %374 = vmatpush3.msra.mxu0 %v23_v50  ;;  %420 = vmatprep.subr.mxu1 %v460_v4  ;;  %p446_p4 = pnand %p445_p3, %p439_p0 }
  0x20   :  { %375 = vmatprep.subr.mxu0 %v38_v51  ;;  %421 = vmatpush3.msra.mxu1 %v236_v54 }
  0x21   :  { %376 = vmatpush3.msra.mxu0 %v22_v52  ;;  %422 = vmatprep.subr.mxu1 %v460_v4 }
  0x22   :  { %156 = vmatmul.mubr.f32.vlgmr.msra.gmra.mxu0 %v77_v29  ;;  %423 = vmatpush3.msra.mxu1 %v235_v55 }
  0x23   :  { %424 = vmatprep.subr.mxu1 %v460_v4 }
  0x24   :  { %425 = vmatpush3.msra.mxu1 %v234_v56 }
  0x25   :  { %426 = vmatprep.subr.mxu1 %v460_v4 }
  0x26   :  { %427 = vmatpush3.msra.mxu1 %v233_v57 }
  0x27   :  { %428 = vmatprep.subr.mxu1 %v460_v4  ;;  %v342_v4 = vld [vmem:[%s670_s4] ss:$0 sm:$0xff] }
  0x28   :  { %429 = vmatpush3.msra.mxu1 %v232_v58 }
  0xd9   :  { %v227_v59 = vpop.f32.mrf.mxu1 }
  0xdb   :  { %v415_v60 = vpop.f32.mrf.mxu1 }
  0xe2   :  { %v377_v61 = vpop.f32.mrf.mxu0 }
  0xe4   :  { %v378_v62 = vpop.f32.mrf.mxu0 }
  0xe5   :  { %v379_v0 = vadd.f32 %v378_v62, %v377_v61 }
  0xe7   :  { %v158_v1 = vadd.f32 %v379_v0, %v340_v63 }
  0xe9   :  { %v228_v2 = vadd.f32 %v227_v59, %v158_v1 }
  0xeb   :  { %v231_v3 = vmax.f32 %v228_v2, 0.0 }
  0xed   :  { %431 = vmatmul.mubr.msk.f32.vlgmr.msra.gmra.mxu1 %vm246_vm3, %v231_v3 }
 0x1ad   :  { %v320_v5 = vpop.f32.mrf.mxu1 }
 0x1ae   :  { %v321_v6 = vadd.f32 %v342_v4, %v320_v5 }
 0x1af   :  { %v432_v7 = vpop.f32.mrf.mxu1 }
 0x1b0   :  { %325 = vst.msk [vmem:[#allocation2] sm:$0x3] %vm324_vm4, %v321_v6 }
 0x1b1   :  { %449 = shalt.err (!%p446_p4)
}
 0x1b2   :  { %335 = dma.vmem_to_hbm [thread:$0]  %s333_s14, 32, %s671_s5, [#allocation3]  }
 0x1b3   :  { %458 = dma.done.wait [#allocation3], 32  }
 0x1b4   :  { %459 = vsyncadd [#allocation3], 4294967264 }
 0x1b5   :  { %339 = vsyncpa [#allocation3], 1 }

</bundles_post_ra>
